<compile_context>
chip_gen: v6e
topology: v6e:2x2x1
jax: 0.10.0
libtpu: 0.0.40
codegen_flags: <defaults>
</compile_context>

<pallas_src>
import functools

import jax
import jax.numpy as jnp
from jax.experimental import pallas as pl
from jax.experimental.pallas import tpu as pltpu

LANE = 128       # TPU vreg lane width
SUBLANE = 8      # TPU vreg sublane count
NEG_LARGE = -1e30

# Conservative scoped-VMEM ceiling, safe on every generation (v7x: 64 MiB/TC).
_VMEM_CEILING = 56 * 1024 * 1024
# Budget used when sizing the batch tile (leaves room for Mosaic scratch).
_VMEM_TILE_BUDGET = 40 * 1024 * 1024


def _round_up(n, m):
    return ((n + m - 1) // m) * m


def linear_softmax_kernel(x_ref, wt_ref, b_ref, o_ref):
    # x_ref : (TB, IN)       activation dtype (f32) -- bf16 cast fused below
    # wt_ref: (IN, OUT_PAD)  bf16   -- VMEM-resident across the whole grid
    # b_ref : (1, OUT_PAD)   f32    -- padded columns hold -1e30
    # o_ref : (TB, OUT_PAD)  activation dtype, lane-dense (OUT_PAD % 128 == 0)
    x = x_ref[...].astype(jnp.bfloat16)                 # fused cast (VPU, hidden under dot)
    logits = jnp.dot(x, wt_ref[...],
                     preferred_element_type=jnp.float32) + b_ref[...]

    # Numerically-stable softmax over the feature axis (f32 throughout; v5e-safe).
    m = jnp.max(logits, axis=-1, keepdims=True)
    e = jnp.exp(logits - m)                             # padded cols -> exp(-1e30) == 0
    denom = jnp.sum(e, axis=-1, keepdims=True)

    inv = pl.reciprocal(denom, approx=True)             # EUP slot (free vs VALU)
    inv = inv * (2.0 - denom * inv)                     # one Newton step -> full f32 precision
    o_ref[...] = (e * inv).astype(o_ref.dtype)


def prepare_params(w, b):
    """One-time parameter prep (hoisted out of the per-call forward path).

    w: (OUT, IN) f32 (PyTorch nn.Linear layout), b: (OUT,) f32.
    Returns (wt_pad, b_pad, out_units):
      wt_pad: (IN, OUT_PAD) bf16, zero-padded extra columns,
      b_pad : (1, OUT_PAD) f32, -1e30 in the padded columns.
    """
    out_units, in_units = w.shape
    out_pad = _round_up(out_units, LANE)

    wt_pad = jnp.zeros((in_units, out_pad), jnp.bfloat16)
    wt_pad = wt_pad.at[:, :out_units].set(w.T.astype(jnp.bfloat16))

    b_pad = jnp.full((1, out_pad), NEG_LARGE, jnp.float32)
    b_pad = b_pad.at[:, :out_units].set(b.astype(jnp.float32))
    return wt_pad, b_pad, out_units


def _choose_batch_tile(batch, in_units, out_pad, x_bytes, o_bytes):
    """VMEM-budgeted, megacore-aware batch tile (multiple of 8 sublanes)."""
    b_rounded = _round_up(batch, SUBLANE)
    # Resident operands (assume the pipeline double-buffers them too).
    resident = 2 * (in_units * out_pad * 2 + out_pad * 4)
    # Per-row cost of the double-buffered x / out tiles.
    per_row = 2 * (in_units * x_bytes + out_pad * o_bytes)

    avail = _VMEM_TILE_BUDGET - resident
    if avail <= per_row * SUBLANE:
        # W barely fits (or not): minimal tile; large layers need the OUT/K-tiled
        # online-softmax variant instead (see header note).
        tb_budget = SUBLANE
    else:
        tb_budget = (avail // per_row) // SUBLANE * SUBLANE

    tb = min(512, b_rounded, tb_budget)
    # v7x has 2 TensorCores: keep >= 2 grid steps whenever the batch is big
    # enough to split so the "parallel" axis actually shards across cores.
    if b_rounded >= 2 * SUBLANE:
        tb = min(tb, _round_up(pl.cdiv(b_rounded, 2), SUBLANE))
    return max(SUBLANE, tb)


@functools.partial(jax.jit, static_argnames=("out_units", "out_dtype"))
def net_forward(x, wt_pad, b_pad, out_units, out_dtype=None):
    """softmax(x @ W^T + b) over the feature axis. x: (B, IN)."""
    B, in_units = x.shape
    out_pad = wt_pad.shape[1]
    out_dtype = x.dtype if out_dtype is None else out_dtype

    x_bytes = x.dtype.itemsize
    o_bytes = jnp.dtype(out_dtype).itemsize

    tb = _choose_batch_tile(B, in_units, out_pad, x_bytes, o_bytes)
    # Ragged trailing block: garbage rows only affect themselves (row-wise
    # softmax) and their OOB stores are dropped, so no batch padding is needed.
    grid = (pl.cdiv(B, tb),)

    # Scoped-VMEM request from the actual footprint, with headroom for Mosaic
    # internal scratch / softmax temporaries; capped under v7x's 64 MiB.
    footprint = (2 * tb * in_units * x_bytes        # x tiles (double-buffered)
                 + 2 * tb * out_pad * o_bytes       # out tiles (double-buffered)
                 + 2 * in_units * out_pad * 2       # resident bf16 weight
                 + 2 * out_pad * 4)                 # resident f32 bias
    vmem_limit = min(_VMEM_CEILING,
                     max(int(footprint * 1.5) + (2 << 20), 16 << 20))

    flops = 2 * B * in_units * out_pad
    bytes_accessed = (B * in_units * x_bytes        # x (read once, no wrapper copy)
                      + in_units * out_pad * 2      # W (bf16)
                      + out_pad * 4                 # bias (f32)
                      + B * out_pad * o_bytes)      # output (activation dtype)

    out = pl.pallas_call(
        linear_softmax_kernel,
        out_shape=jax.ShapeDtypeStruct((B, out_pad), out_dtype),
        grid=grid,
        in_specs=[
            pl.BlockSpec((tb, in_units), lambda i: (i, 0)),        # x tile (pipelined)
            pl.BlockSpec((in_units, out_pad), lambda i: (0, 0)),   # weight (resident)
            pl.BlockSpec((1, out_pad), lambda i: (0, 0)),          # bias (resident)
        ],
        out_specs=pl.BlockSpec((tb, out_pad), lambda i: (i, 0)),
        compiler_params=pltpu.CompilerParams(
            dimension_semantics=("parallel",),
            vmem_limit_bytes=vmem_limit),
        cost_estimate=pl.CostEstimate(
            flops=flops,
            transcendentals=B * out_pad,
            bytes_accessed=bytes_accessed),
    )(x, wt_pad, b_pad)

    # Only pay for a slice when feature padding actually exists; the batch
    # dimension is never padded anymore.
    if out_pad != out_units:
        out = out[:, :out_units]
    return out


if __name__ == "__main__":
    # Small shapes consistent with the module (Linear(in, out) + Softmax).
    B, IN, OUT = 8, 32, 4

    key = jax.random.PRNGKey(0)
    kx, kw, kb = jax.random.split(key, 3)

    # nn.Linear default init: U(-1/sqrt(in_units), 1/sqrt(in_units)).
    bound = 1.0 / jnp.sqrt(jnp.float32(IN))
    w = jax.random.uniform(kw, (OUT, IN), jnp.float32, -bound, bound)
    b = jax.random.uniform(kb, (OUT,), jnp.float32, -bound, bound)
    x = jax.random.normal(kx, (B, IN), jnp.float32)

    wt_pad, b_pad, out_units = prepare_params(w, b)   # one-time prep
    y = net_forward(x, wt_pad, b_pad, out_units)
    y = jax.block_until_ready(y)

    # Reference in pure f32 JAX; tolerance covers the bf16 MXU operands.
    ref = jax.nn.softmax(x @ w.T + b, axis=-1)
    assert y.shape == (B, OUT)
    assert y.dtype == x.dtype
    assert jnp.allclose(y, ref, atol=2e-2, rtol=2e-2), "mismatch vs reference"
    assert jnp.allclose(jnp.sum(y, axis=-1), 1.0, atol=1e-3), "rows must sum to 1"

    print("KERNEL_OK")
</pallas_src>

<mosaic_0001>
module attributes {stable_mosaic.version = 11 : i64} {
  func.func @linear_softmax_kernel(%arg0: i32, %arg1: memref<8x32xf32, #tpu.memory_space<vmem>>, %arg2: memref<32x128xbf16, #tpu.memory_space<vmem>>, %arg3: memref<1x128xf32, #tpu.memory_space<vmem>>, %arg4: memref<8x128xf32, #tpu.memory_space<vmem>>) attributes {dimension_semantics = [#tpu.dimension_semantics<parallel>], iteration_bounds = array<i64: 1>, scalar_prefetch = 0 : i64, scratch_operands = 0 : i64, tpu.core_type = #tpu.core_type<tc>, window_params = [{transform_indices = @transform_0, window_bounds = array<i64: 8, 32>}, {pipeline_mode = #tpu.pipeline_mode<synchronous>, transform_indices = @transform_1, window_bounds = array<i64: 32, 128>}, {pipeline_mode = #tpu.pipeline_mode<synchronous>, transform_indices = @transform_2, window_bounds = array<i64: 1, 128>}, {transform_indices = @transform_3, window_bounds = array<i64: 8, 128>}]} {
    %c0 = arith.constant 0 : index
    %c0_0 = arith.constant 0 : index
    %0 = vector.load %arg1[%c0, %c0_0] : memref<8x32xf32, #tpu.memory_space<vmem>>, vector<8x32xf32>
    %1 = arith.truncf %0 : vector<8x32xf32> to vector<8x32xbf16>
    %c0_1 = arith.constant 0 : index
    %c0_2 = arith.constant 0 : index
    %2 = vector.load %arg2[%c0_1, %c0_2] : memref<32x128xbf16, #tpu.memory_space<vmem>>, vector<32x128xbf16>
    %cst = arith.constant dense<0.000000e+00> : vector<8x128xf32>
    %3 = tpu.matmul %1, %2, %cst {dimension_numbers = #tpu.dot_dimension_numbers<[1], [0], [0], [1], [0, 0, 1, 1], [], []>} : vector<8x32xbf16>, vector<32x128xbf16>, vector<8x128xf32> -> vector<8x128xf32>
    %c0_3 = arith.constant 0 : index
    %c0_4 = arith.constant 0 : index
    %4 = vector.load %arg3[%c0_3, %c0_4] : memref<1x128xf32, #tpu.memory_space<vmem>>, vector<1x128xf32>
    %5 = vector.broadcast %4 : vector<1x128xf32> to vector<8x128xf32>
    %6 = arith.addf %3, %5 : vector<8x128xf32>
    %cst_5 = arith.constant dense<0xFF800000> : vector<8xf32>
    %7 = vector.multi_reduction <maximumf>, %6, %cst_5 [1] : vector<8x128xf32> to vector<8xf32>
    %8 = vector.shape_cast %7 : vector<8xf32> to vector<8x1xf32>
    %9 = vector.broadcast %8 : vector<8x1xf32> to vector<8x128xf32>
    %10 = arith.subf %6, %9 : vector<8x128xf32>
    %11 = math.exp %10 : vector<8x128xf32>
    %cst_6 = arith.constant dense<0.000000e+00> : vector<8xf32>
    %12 = vector.multi_reduction <add>, %11, %cst_6 [1] : vector<8x128xf32> to vector<8xf32>
    %13 = vector.shape_cast %12 : vector<8xf32> to vector<8x1xf32>
    %14 = tpu.reciprocal %13 {approx = true} : vector<8x1xf32> -> vector<8x1xf32>
    %15 = arith.mulf %13, %14 : vector<8x1xf32>
    %cst_7 = arith.constant 2.000000e+00 : f32
    %16 = vector.broadcast %cst_7 : f32 to vector<8x1xf32>
    %17 = arith.subf %16, %15 : vector<8x1xf32>
    %18 = arith.mulf %14, %17 : vector<8x1xf32>
    %19 = vector.broadcast %18 : vector<8x1xf32> to vector<8x128xf32>
    %20 = arith.mulf %11, %19 : vector<8x128xf32>
    %c0_8 = arith.constant 0 : index
    %c0_9 = arith.constant 0 : index
    %21 = vector.load %arg4[%c0_8, %c0_9] : memref<8x128xf32, #tpu.memory_space<vmem>>, vector<8x128xf32>
    tpu.vector_store %arg4[%c0_8, %c0_9], %20 {strides = array<i32>} : memref<8x128xf32, #tpu.memory_space<vmem>>, vector<8x128xf32>,
    return
  }
  func.func @transform_0(%arg0: i32) -> (i32, i32) {
    %c0_i32 = arith.constant 0 : i32
    %c0_i32_0 = arith.constant 0 : i32
    return %arg0, %c0_i32 : i32, i32
  }
  func.func @transform_1(%arg0: i32) -> (i32, i32) {
    %c0_i32 = arith.constant 0 : i32
    %c0_i32_0 = arith.constant 0 : i32
    %c0_i32_1 = arith.constant 0 : i32
    return %c0_i32, %c0_i32_0 : i32, i32
  }
  func.func @transform_2(%arg0: i32) -> (i32, i32) {
    %c0_i32 = arith.constant 0 : i32
    %c0_i32_0 = arith.constant 0 : i32
    %c0_i32_1 = arith.constant 0 : i32
    return %c0_i32, %c0_i32_0 : i32, i32
  }
  func.func @transform_3(%arg0: i32) -> (i32, i32) {
    %c0_i32 = arith.constant 0 : i32
    %c0_i32_0 = arith.constant 0 : i32
    return %arg0, %c0_i32 : i32, i32
  }
}

</mosaic_0001>

<bundles_post_ra>
// kernel: net_forward.1
= control target key start
LH: loop header
LB: loop body
LE: loop exit
PB: predicated region body
PF: predicated region fallthrough
CT: control target
= control target key end

     0   :  { %8 = vsyncpa [#allocation3], 0  ;;  %s238_s0 = inlined_call_operand.hbm [shape: f32[8,32], index: 0, kind: input, shape index: {}]   ;;  %s239_s1 = inlined_call_operand.hbm [shape: bf16[32,128], index: 1, kind: input, shape index: {}]   ;;  %s240_s2 = inlined_call_operand.vmem [shape: f32[1,128], index: 2, kind: input, shape index: {}]   ;;  %s241_s3 = inlined_call_operand.vmem [shape: f32[8,128], index: 3, kind: output, shape index: {}]  }
   0x1   :  { %9 = vsyncpa [#allocation5], 0  ;;  %s200_s12 = smov [#allocation2]   ;;  %s201_s14 = smov [#allocation4]  }
   0x2   :  { %s16_s13 = sshll.u32 %s200_s12, 4  ;;  %s25_s15 = sshll.u32 %s201_s14, 4  ;;  %s17_s13 = int_to_ptr.vmem [resolvable:$true] %s16_s13  ;;  %s26_s15 = int_to_ptr.vmem [resolvable:$true] %s25_s15 }
   0x3   :  { %s164_s16 = scalar_lea.vmem %s17_s13, 128  ;;  %p169_p1 = scmp.lt.s32.totalorder %s17_s13, %s17_s13 }
   0x4   :  { %p165_p0 = scmp.ne.s32.totalorder %s17_s13, %s164_s16  ;;  %p170_p2 = scmp.lt.s32.totalorder %s164_s16, %s164_s16 }
   0x6   :  { %p171_p3 = por %p170_p2, %p169_p1 }
   0x8   :  { %p172_p4 = pnand %p171_p3, %p165_p0 }
   0xa   :  { %175 = shalt.err (!%p172_p4)
}
   0xb   :  { %19 = dma.hbm_to_vmem [thread:$0]  %s238_s0, 128, %s17_s13, [#allocation3]  }
   0xc   :  { %s184_s19 = scalar_lea.vmem %s26_s15, 256  ;;  %p189_p6 = scmp.lt.s32.totalorder %s26_s15, %s26_s15 }
   0xd   :  { %p185_p5 = scmp.ne.s32.totalorder %s26_s15, %s184_s19  ;;  %p190_p7 = scmp.lt.s32.totalorder %s184_s19, %s184_s19 }
   0xf   :  { %p191_p8 = por %p190_p7, %p189_p6 }
  0x11   :  { %p192_p9 = pnand %p191_p8, %p185_p5 }
  0x13   :  { %195 = shalt.err (!%p192_p9)
}
  0x14   :  { %s202_s20 = smov 64   ;;  %s203_s21 = smov 4  }
  0x15   :  { %31 = dma.hbm_to_vmem [thread:$0]  %s239_s1, 256, %s26_s15, [#allocation5], %s202_s20, %s202_s20, %s203_s21  }
  0x16   :  { %196 = dma.done.wait [#allocation3], 128  }
  0x17   :  { %197 = vsyncadd [#allocation3], 4294967168 }
  0x18   :  { %198 = dma.done.wait [#allocation5], 256  }
  0x19   :  { %199 = vsyncadd [#allocation5], 4294967040  ;;  %v204_v0 = vmov 0.0   ;;  %vm205_vm0 = vmmov 0   ;;  %v150_v1 = vld [vmem:[#allocation4 + $0x8] sm:$0xff]   ;;  %v151_v2 = vld [vmem:[#allocation4] sm:$0xff]  }
  0x1a   :  { %136 = vmatprep.subr.bf16.mxu0 %v204_v0  ;;  %140 = vmatprep.mubr.msk.bf16.mxu0 %vm205_vm0, %v204_v0  ;;  %v41_v3 = vld [vmem:[#allocation2] sm:$0xff]  ;;  %vm66_vm1 = vcmask 261120  }
  0x1b   :  { %137 = vmatpush3.bf16.msra.mxu0 %v150_v1  ;;  %v42_v4 = vpack.c.bf16 %v41_v3, %v41_v3  ;;  %v129_v5 = vld [vmem:[%s240_s2] ss:$0 sm:$0xff] }
  0x1c   :  { %138 = vmatprep.subr.bf16.mxu0 %v204_v0 }
  0x1f   :  { %139 = vmatpush3.bf16.msra.mxu0 %v151_v2 }
  0x22   :  { %141 = vmatmul.mubr.msk.bf16.vlgmr.msra.gmra.mxu0 %vm66_vm1, %v42_v4 }
  0xe2   :  { %v104_v6 = vpop.f32.mrf.mxu0 }
  0xe3   :  { %v105_v7 = vadd.f32 %v129_v5, %v104_v6 }
  0xe4   :  { %v142_v8 = vpop.f32.mrf.mxu0 }
  0xe5   :  { %110 = vmax.xlane.f32.xlu0 %v105_v7 }
  0xe6   :  { %v107_v9 = vpop.f32.mrf.mxu0 }
  0xe8   :  { %v143_v10 = vpop.f32.mrf.mxu0 }
 0x16e   :  { %v111_v11 = vpop.xlane.xlu0 %110 }
 0x16f   :  { %v112_v12 = vsub.f32 %v105_v7, %v111_v11 }
 0x171   :  { %v113_v13 = vmul.f32 1.442695, %v112_v12 }
 0x173   :  { %152 = vpow2.f32 %v113_v13 }
 0x180   :  { %v153_v14 = vpop.eup %152 }
 0x181   :  { %115 = vadd.xlane.f32.xlu0 %v153_v14 }
 0x20a   :  { %v116_v15 = vpop.xlane.xlu0 %115 }
 0x20b   :  { %154 = vrcp.f32 %v116_v15 }
 0x218   :  { %v155_v16 = vpop.eup %154 }
 0x219   :  { %v118_v17 = vmul.f32 %v155_v16, %v116_v15 }
 0x21b   :  { %v119_v18 = vsub.f32 2.0, %v118_v17 }
 0x21d   :  { %v120_v19 = vmul.f32 %v155_v16, %v119_v18 }
 0x21f   :  { %v121_v20 = vmul.f32 %v153_v14, %v120_v19 }
 0x221   :  { %122 = vst [vmem:[%s241_s3] sm:$0xff] %v121_v20 }
 0x222   :  { %127 = vsyncpa [#allocation3], 1 }
 0x223   :  { %128 = vsyncpa [#allocation5], 1 }

</bundles_post_ra>
